<compile_context>
chip_gen: v7x
topology: tpu7x:2x2x1
jax: 0.10.0
libtpu: 0.0.40
codegen_flags: <defaults>
</compile_context>

<pallas_src>
import jax
import jax.numpy as jnp
from jax.experimental import pallas as pl
from jax.experimental.pallas import tpu as pltpu

OUT_DIM = 2
DEFAULT_BATCH_TILE = 4096   # rows per grid step (multiple of 8); sweep 2048-8192


def _round_up(n, m):
    return ((n + m - 1) // m) * m


def mlp_kernel(x_ref, w1_ref, b1_ref, w2_ref, b2_ref, w3_ref, b3_ref, o_ref):
    # Whole MLP hot path (3 matmuls + ReLU/ReLU/Sigmoid) fused in one kernel.
    # Cast after the DMA: x.float() semantics even if x is stored bf16/f16.
    x = x_ref[...].astype(jnp.float32)

    h1 = jnp.dot(x, w1_ref[...], preferred_element_type=jnp.float32) + b1_ref[...]
    h1 = jnp.maximum(h1, 0.0)                                      # ReLU

    h2 = jnp.dot(h1, w2_ref[...], preferred_element_type=jnp.float32) + b2_ref[...]
    h2 = jnp.maximum(h2, 0.0)                                      # ReLU

    # Final layer kept at the true out_dim (=2): bias add + sigmoid only touch the
    # live columns; the (bt, out_dim) store is masked-lane but tiny (8 B/row).
    logits = jnp.dot(h2, w3_ref[...], preferred_element_type=jnp.float32) + b3_ref[...]
    o_ref[...] = jax.nn.sigmoid(logits)                            # Sigmoid


def mymodule_forward(x, params, *, batch_tile=DEFAULT_BATCH_TILE):
    """x: (B, in_features). params: w1,b1,w2,b2,w3,b3, weights stored (fan_in, fan_out)."""
    B, in_features = x.shape
    width = params["w1"].shape[1]
    out_dim = params["w3"].shape[1]

    # Batch tile: multiple of 8 sublanes, capped so the grid has >= 2 steps whenever
    # possible (lets dimension_semantics=("parallel",) use both v7x TensorCores).
    bt = min(batch_tile, max(8, _round_up(pl.cdiv(B, 2), 8)))
    grid = (pl.cdiv(B, bt),)   # ragged B handled by Pallas partial edge blocks

    # Weights/biases are tiny full-array blocks; constant index_map keeps them
    # resident in VMEM across grid steps.
    w_spec = lambda shape: pl.BlockSpec(shape, lambda i: (0, 0))

    weight_bytes = 4 * (in_features * width + width * width + width * out_dim
                        + 2 * width + out_dim)
    cost = pl.CostEstimate(
        flops=2 * B * (in_features * width + width * width + width * out_dim),
        transcendentals=B * out_dim,                       # sigmoid on live cols only
        bytes_accessed=B * (in_features * x.dtype.itemsize + out_dim * 4) + weight_bytes,
    )

    return pl.pallas_call(
        mlp_kernel,
        out_shape=jax.ShapeDtypeStruct((B, out_dim), jnp.float32),
        grid_spec=pltpu.PrefetchScalarGridSpec(
            num_scalar_prefetch=0,
            grid=grid,
            in_specs=[
                pl.BlockSpec((bt, in_features), lambda i: (i, 0)),   # x row tile
                w_spec((in_features, width)),    # w1
                w_spec((1, width)),              # b1
                w_spec((width, width)),          # w2
                w_spec((1, width)),              # b2
                w_spec((width, out_dim)),        # w3 (true width, no lane padding)
                w_spec((1, out_dim)),            # b3
            ],
            out_specs=pl.BlockSpec((bt, out_dim), lambda i: (i, 0)),
        ),
        compiler_params=pltpu.CompilerParams(
            dimension_semantics=("parallel",),
        ),
        cost_estimate=cost,
    )(x, params["w1"], params["b1"], params["w2"], params["b2"],
      params["w3"], params["b3"])


def init_params(key, in_features, width, out_dim=OUT_DIM):
    """Deterministic init mimicking nn.Linear's U(-1/sqrt(fan_in), 1/sqrt(fan_in))."""
    ks = jax.random.split(key, 6)

    def linear(kw, kb, fan_in, fan_out):
        bound = 1.0 / jnp.sqrt(fan_in)
        w = jax.random.uniform(kw, (fan_in, fan_out), jnp.float32, -bound, bound)
        b = jax.random.uniform(kb, (1, fan_out), jnp.float32, -bound, bound)
        return w, b

    w1, b1 = linear(ks[0], ks[1], in_features, width)
    w2, b2 = linear(ks[2], ks[3], width, width)
    w3, b3 = linear(ks[4], ks[5], width, out_dim)
    return {"w1": w1, "b1": b1, "w2": w2, "b2": b2, "w3": w3, "b3": b3}


def reference_forward(x, p):
    h1 = jnp.maximum(x.astype(jnp.float32) @ p["w1"] + p["b1"], 0.0)
    h2 = jnp.maximum(h1 @ p["w2"] + p["b2"], 0.0)
    return jax.nn.sigmoid(h2 @ p["w3"] + p["b3"])


if __name__ == "__main__":
    # Small shapes consistent with the module: in_features=32, width=32, out_dim=2.
    in_features, width = 32, 32

    key = jax.random.PRNGKey(0)
    kx, kp, kx2 = jax.random.split(key, 3)
    params = init_params(kp, in_features, width, out_dim=OUT_DIM)

    # 1) Small batch: single grid step, exact block.
    batch = 8
    x = jax.random.normal(kx, (batch, in_features), jnp.float32)
    out = jax.block_until_ready(mymodule_forward(x, params))
    ref = reference_forward(x, params)
    assert out.shape == (batch, OUT_DIM)
    assert jnp.allclose(out, ref, atol=1e-5, rtol=1e-5), "mismatch vs reference (small)"

    # 2) Ragged batch: 2-step "parallel" grid with a partial edge block (no row pad).
    batch2 = 2050
    x2 = jax.random.normal(kx2, (batch2, in_features), jnp.float32)
    out2 = jax.block_until_ready(mymodule_forward(x2, params))
    ref2 = reference_forward(x2, params)
    assert out2.shape == (batch2, OUT_DIM)
    assert jnp.allclose(out2, ref2, atol=1e-5, rtol=1e-5), "mismatch vs reference (tiled)"

    print("KERNEL_OK")
</pallas_src>

<mosaic_0001>
module attributes {stable_mosaic.version = 11 : i64} {
  func.func @mlp_kernel(%arg0: i32, %arg1: memref<8x32xf32, #tpu.memory_space<vmem>>, %arg2: memref<32x32xf32, #tpu.memory_space<vmem>>, %arg3: memref<1x32xf32, #tpu.memory_space<vmem>>, %arg4: memref<32x32xf32, #tpu.memory_space<vmem>>, %arg5: memref<1x32xf32, #tpu.memory_space<vmem>>, %arg6: memref<32x2xf32, #tpu.memory_space<vmem>>, %arg7: memref<1x2xf32, #tpu.memory_space<vmem>>, %arg8: memref<8x2xf32, #tpu.memory_space<vmem>>) attributes {dimension_semantics = [#tpu.dimension_semantics<parallel>], iteration_bounds = array<i64: 1>, scalar_prefetch = 0 : i64, scratch_operands = 0 : i64, tpu.core_type = #tpu.core_type<tc>, window_params = [{transform_indices = @transform_0, window_bounds = array<i64: 8, 32>}, {pipeline_mode = #tpu.pipeline_mode<synchronous>, transform_indices = @transform_1, window_bounds = array<i64: 32, 32>}, {pipeline_mode = #tpu.pipeline_mode<synchronous>, transform_indices = @transform_2, window_bounds = array<i64: 1, 32>}, {pipeline_mode = #tpu.pipeline_mode<synchronous>, transform_indices = @transform_3, window_bounds = array<i64: 32, 32>}, {pipeline_mode = #tpu.pipeline_mode<synchronous>, transform_indices = @transform_4, window_bounds = array<i64: 1, 32>}, {pipeline_mode = #tpu.pipeline_mode<synchronous>, transform_indices = @transform_5, window_bounds = array<i64: 32, 2>}, {pipeline_mode = #tpu.pipeline_mode<synchronous>, transform_indices = @transform_6, window_bounds = array<i64: 1, 2>}, {transform_indices = @transform_7, window_bounds = array<i64: 8, 2>}]} {
    %c0 = arith.constant 0 : index
    %c0_0 = arith.constant 0 : index
    %0 = vector.load %arg1[%c0, %c0_0] : memref<8x32xf32, #tpu.memory_space<vmem>>, vector<8x32xf32>
    %c0_1 = arith.constant 0 : index
    %c0_2 = arith.constant 0 : index
    %1 = vector.load %arg2[%c0_1, %c0_2] : memref<32x32xf32, #tpu.memory_space<vmem>>, vector<32x32xf32>
    %cst = arith.constant dense<0.000000e+00> : vector<8x32xf32>
    %2 = tpu.matmul %0, %1, %cst {dimension_numbers = #tpu.dot_dimension_numbers<[1], [0], [0], [1], [0, 0, 1, 1], [], []>} : vector<8x32xf32>, vector<32x32xf32>, vector<8x32xf32> -> vector<8x32xf32>
    %c0_3 = arith.constant 0 : index
    %c0_4 = arith.constant 0 : index
    %3 = vector.load %arg3[%c0_3, %c0_4] : memref<1x32xf32, #tpu.memory_space<vmem>>, vector<1x32xf32>
    %4 = vector.broadcast %3 : vector<1x32xf32> to vector<8x32xf32>
    %5 = arith.addf %2, %4 : vector<8x32xf32>
    %cst_5 = arith.constant 0.000000e+00 : f32
    %6 = vector.broadcast %cst_5 : f32 to vector<8x32xf32>
    %7 = arith.maximumf %5, %6 : vector<8x32xf32>
    %c0_6 = arith.constant 0 : index
    %c0_7 = arith.constant 0 : index
    %8 = vector.load %arg4[%c0_6, %c0_7] : memref<32x32xf32, #tpu.memory_space<vmem>>, vector<32x32xf32>
    %cst_8 = arith.constant dense<0.000000e+00> : vector<8x32xf32>
    %9 = tpu.matmul %7, %8, %cst_8 {dimension_numbers = #tpu.dot_dimension_numbers<[1], [0], [0], [1], [0, 0, 1, 1], [], []>} : vector<8x32xf32>, vector<32x32xf32>, vector<8x32xf32> -> vector<8x32xf32>
    %c0_9 = arith.constant 0 : index
    %c0_10 = arith.constant 0 : index
    %10 = vector.load %arg5[%c0_9, %c0_10] : memref<1x32xf32, #tpu.memory_space<vmem>>, vector<1x32xf32>
    %11 = vector.broadcast %10 : vector<1x32xf32> to vector<8x32xf32>
    %12 = arith.addf %9, %11 : vector<8x32xf32>
    %cst_11 = arith.constant 0.000000e+00 : f32
    %13 = vector.broadcast %cst_11 : f32 to vector<8x32xf32>
    %14 = arith.maximumf %12, %13 : vector<8x32xf32>
    %c0_12 = arith.constant 0 : index
    %c0_13 = arith.constant 0 : index
    %15 = vector.load %arg6[%c0_12, %c0_13] : memref<32x2xf32, #tpu.memory_space<vmem>>, vector<32x2xf32>
    %cst_14 = arith.constant dense<0.000000e+00> : vector<8x2xf32>
    %16 = tpu.matmul %14, %15, %cst_14 {dimension_numbers = #tpu.dot_dimension_numbers<[1], [0], [0], [1], [0, 0, 1, 1], [], []>} : vector<8x32xf32>, vector<32x2xf32>, vector<8x2xf32> -> vector<8x2xf32>
    %c0_15 = arith.constant 0 : index
    %c0_16 = arith.constant 0 : index
    %17 = vector.load %arg7[%c0_15, %c0_16] : memref<1x2xf32, #tpu.memory_space<vmem>>, vector<1x2xf32>
    %18 = vector.broadcast %17 : vector<1x2xf32> to vector<8x2xf32>
    %19 = arith.addf %16, %18 : vector<8x2xf32>
    %20 = arith.negf %19 : vector<8x2xf32>
    %21 = math.exp %20 : vector<8x2xf32>
    %cst_17 = arith.constant 1.000000e+00 : f32
    %22 = vector.broadcast %cst_17 : f32 to vector<8x2xf32>
    %23 = arith.addf %22, %21 : vector<8x2xf32>
    %24 = arith.divf %22, %23 : vector<8x2xf32>
    %c0_18 = arith.constant 0 : index
    %c0_19 = arith.constant 0 : index
    %25 = vector.load %arg8[%c0_18, %c0_19] : memref<8x2xf32, #tpu.memory_space<vmem>>, vector<8x2xf32>
    tpu.vector_store %arg8[%c0_18, %c0_19], %24 {strides = array<i32>} : memref<8x2xf32, #tpu.memory_space<vmem>>, vector<8x2xf32>,
    return
  }
  func.func @transform_0(%arg0: i32) -> (i32, i32) {
    %c0_i32 = arith.constant 0 : i32
    %c0_i32_0 = arith.constant 0 : i32
    return %arg0, %c0_i32 : i32, i32
  }
  func.func @transform_1(%arg0: i32) -> (i32, i32) {
    %c0_i32 = arith.constant 0 : i32
    %c0_i32_0 = arith.constant 0 : i32
    %c0_i32_1 = arith.constant 0 : i32
    return %c0_i32, %c0_i32_0 : i32, i32
  }
  func.func @transform_2(%arg0: i32) -> (i32, i32) {
    %c0_i32 = arith.constant 0 : i32
    %c0_i32_0 = arith.constant 0 : i32
    %c0_i32_1 = arith.constant 0 : i32
    return %c0_i32, %c0_i32_0 : i32, i32
  }
  func.func @transform_3(%arg0: i32) -> (i32, i32) {
    %c0_i32 = arith.constant 0 : i32
    %c0_i32_0 = arith.constant 0 : i32
    %c0_i32_1 = arith.constant 0 : i32
    return %c0_i32, %c0_i32_0 : i32, i32
  }
  func.func @transform_4(%arg0: i32) -> (i32, i32) {
    %c0_i32 = arith.constant 0 : i32
    %c0_i32_0 = arith.constant 0 : i32
    %c0_i32_1 = arith.constant 0 : i32
    return %c0_i32, %c0_i32_0 : i32, i32
  }
  func.func @transform_5(%arg0: i32) -> (i32, i32) {
    %c0_i32 = arith.constant 0 : i32
    %c0_i32_0 = arith.constant 0 : i32
    %c0_i32_1 = arith.constant 0 : i32
    return %c0_i32, %c0_i32_0 : i32, i32
  }
  func.func @transform_6(%arg0: i32) -> (i32, i32) {
    %c0_i32 = arith.constant 0 : i32
    %c0_i32_0 = arith.constant 0 : i32
    %c0_i32_1 = arith.constant 0 : i32
    return %c0_i32, %c0_i32_0 : i32, i32
  }
  func.func @transform_7(%arg0: i32) -> (i32, i32) {
    %c0_i32 = arith.constant 0 : i32
    %c0_i32_0 = arith.constant 0 : i32
    return %arg0, %c0_i32 : i32, i32
  }
}

</mosaic_0001>

<bundles_post_ra>
// kernel: tpu_custom_call.1
= control target key start
LH: loop header
LB: loop body
LE: loop exit
PB: predicated region body
PF: predicated region fallthrough
CT: control target
= control target key end

     0   :  { %12 = vsyncpa [#allocation3], 0  ;;  %s574_s0 = inlined_call_operand.hbm [shape: f32[8,32], index: 0, kind: input, shape index: {}]   ;;  %s575_s1 = inlined_call_operand.vmem [shape: f32[32,32], index: 1, kind: input, shape index: {}]   ;;  %s576_s2 = inlined_call_operand.vmem [shape: f32[1,32], index: 2, kind: input, shape index: {}]   ;;  %s577_s3 = inlined_call_operand.hbm [shape: f32[32,32], index: 3, kind: input, shape index: {}]   ;;  %s578_s4 = inlined_call_operand.vmem [shape: f32[1,32], index: 4, kind: input, shape index: {}]   ;;  %s579_s5 = inlined_call_operand.vmem [shape: f32[32,2], index: 5, kind: input, shape index: {}]   ;;  %s580_s6 = inlined_call_operand.vmem [shape: f32[1,2], index: 6, kind: input, shape index: {}]   ;;  %s581_s7 = inlined_call_operand.vmem [shape: f32[8,2], index: 7, kind: output, shape index: {}]  }
   0x1   :  { %13 = vsyncpa [#allocation5], 0  ;;  %s454_s24 = smov [#allocation2]   ;;  %s455_s26 = smov [#allocation4]  }
   0x2   :  { %s20_s25 = sshll.u32 %s454_s24, 4  ;;  %s33_s27 = sshll.u32 %s455_s26, 4  ;;  %s21_s25 = int_to_ptr.vmem [resolvable:$true] %s20_s25  ;;  %s501_s27 = int_to_ptr.vmem [resolvable:$true] %s33_s27 }
   0x3   :  { %s406_s30 = scalar_lea.hbm %s574_s0, 128 }
   0x4   :  { %p407_p0 = scmp.ne.s32.totalorder %s574_s0, %s406_s30  ;;  %p410_p1 = scmp.lt.u32.totalorder %s406_s30, %s574_s0 }
   0x6   :  { %p412_p2 = pnand %p410_p1, %p407_p0 }
   0x8   :  { %415 = shalt.err (!%p412_p2)
}
   0x9   :  { %s416_s12 = scalar_lea.vmem %s21_s25, 128  ;;  %p421_p4 = scmp.lt.s32.totalorder %s21_s25, %s21_s25 }
   0xa   :  { %p417_p3 = scmp.ne.s32.totalorder %s21_s25, %s416_s12  ;;  %p422_p5 = scmp.lt.s32.totalorder %s416_s12, %s416_s12 }
   0xc   :  { %p423_p6 = por %p422_p5, %p421_p4 }
   0xe   :  { %p424_p7 = pnand %p423_p6, %p417_p3 }
  0x10   :  { %427 = shalt.err (!%p424_p7)
}
  0x11   :  { %23 = dma.hbm_to_vmem [thread:$0]  %s574_s0, 128, %s21_s25, [#allocation3]  }
  0x12   :  { %s428_s17 = scalar_lea.hbm %s577_s3, 512 }
  0x13   :  { %p429_p8 = scmp.ne.s32.totalorder %s577_s3, %s428_s17  ;;  %p432_p9 = scmp.lt.u32.totalorder %s428_s17, %s577_s3 }
  0x15   :  { %p434_p10 = pnand %p432_p9, %p429_p8 }
  0x17   :  { %437 = shalt.err (!%p434_p10)
}
  0x18   :  { %s438_s22 = scalar_lea.vmem %s501_s27, 512  ;;  %p443_p12 = scmp.lt.s32.totalorder %s501_s27, %s501_s27 }
  0x19   :  { %p439_p11 = scmp.ne.s32.totalorder %s501_s27, %s438_s22  ;;  %p444_p13 = scmp.lt.s32.totalorder %s438_s22, %s438_s22 }
  0x1b   :  { %p445_p0 = por %p444_p13, %p443_p12 }
  0x1d   :  { %p446_p1 = pnand %p445_p0, %p439_p11 }
  0x1f   :  { %449 = shalt.err (!%p446_p1)
}
  0x20   :  { %s456_s0 = smov 128   ;;  %s457_s23 = smov 8  }
  0x21   :  { %39 = dma.hbm_to_vmem [thread:$0]  %s577_s3, 512, %s501_s27, [#allocation5], %s456_s0, %s456_s0, %s457_s23  }
  0x22   :  { %450 = dma.done.wait [#allocation3], 128  }
  0x23   :  { %451 = vsyncadd [#allocation3], 4294967168 }
  0x24   :  { %452 = dma.done.wait [#allocation5], 512  }
  0x25   :  { %453 = vsyncadd [#allocation5], 4294966784  ;;  %v458_v0 = vmov 0.0|0.0   ;;  %vm459_vm0 = vmmov 0   ;;  %v460_v1 = vmov 0.0   ;;  %v53_v2 = vld [vmem:[%s575_s1] sm:$0xff] }
  0x26   :  { %377 = vmatprep.subr.bf16.mxu0 %v458_v0  ;;  %352 = vmatprep.mubr.msk.f32.mxu0 %vm459_vm0, %v460_v1  ;;  %v54_v3 = vld [vmem:[%s575_s1 + $0x8] sm:$0xff]  ;;  %v55_v4 = vld [vmem:[%s575_s1 + $0x10] sm:$0xff]  ;;  %v56_v6 = vld [vmem:[%s575_s1 + $0x18] sm:$0xff]  ;;  %vm64_vm1 = vcmask 261120   ;;  %vm314_vm2 = vcmask 15360  }
  0x27   :  { %383 = vmatprep.subr.bf16.mxu1 %v458_v0  ;;  %363 = vmatprep.mubr.msk.f32.mxu1 %vm459_vm0, %v460_v1  ;;  %v378_v5 = vpack.c.bf16 %v54_v3, %v53_v2  ;;  %v139_v7 = vld [vmem:[#allocation4] sm:$0xff]  ;;  %v140_v8 = vld [vmem:[#allocation4 + $0x8] sm:$0xff]  ;;  %v381_v9 = vpack.c.bf16 %v56_v6, %v55_v4  ;;  %v52_v11 = vld [vmem:[#allocation2] sm:$0xff] }
  0x28   :  { %v384_v10 = vpack.c.bf16 %v140_v8, %v139_v7  ;;  %v141_v12 = vld [vmem:[#allocation4 + $0x10] sm:$0xff]  ;;  %v142_v13 = vld [vmem:[#allocation4 + $0x18] sm:$0xff]  ;;  %v225_v16 = vld [vmem:[%s579_s5 + $0x8] sm:$0xff] }
  0x29   :  { %379 = vmatpush3.bf16.msra.mxu0 %v378_v5  ;;  %v387_v14 = vpack.c.bf16 %v142_v13, %v141_v12  ;;  %v224_v15 = vld [vmem:[%s579_s5] sm:$0xff]  ;;  %v226_v23 = vld [vmem:[%s579_s5 + $0x10] sm:$0xff]  ;;  %v227_v24 = vld [vmem:[%s579_s5 + $0x18] sm:$0xff] }
  0x2a   :  { %380 = vmatprep.subr.bf16.mxu0 %v458_v0  ;;  %385 = vmatpush3.bf16.msra.mxu1 %v384_v10  ;;  %v390_v17 = vpack.c.bf16 %v225_v16, %v224_v15  ;;  %v322_v18 = vld [vmem:[%s576_s2] ss:$0 sm:$0xff]  ;;  %v393_v25 = vpack.c.bf16 %v227_v24, %v226_v23 }
  0x2b   :  { %386 = vmatprep.subr.bf16.mxu1 %v458_v0  ;;  %v324_v26 = vld [vmem:[%s578_s4] ss:$0 sm:$0xff] }
  0x2c   :  { %v326_v31 = vld [vmem:[%s580_s6] ss:$0 sm:$0xff] }
  0x2d   :  { %382 = vmatpush3.bf16.msra.mxu0 %v381_v9 }
  0x2e   :  { %389 = vmatprep.subr.bf16.mxu0 %v458_v0  ;;  %388 = vmatpush3.bf16.msra.mxu1 %v387_v14 }
  0x30   :  { %353 = vmatmul.mubr.msk.f32.vlgmr.msra.gmra.mrb[0].mxu0 %vm64_vm1, %v52_v11 }
  0x31   :  { %374 = vmatprep.mubr.msk.f32.mxu0 %vm459_vm0, %v460_v1  ;;  %391 = vmatpush3.bf16.msra.mxu0 %v390_v17 }
  0x32   :  { %392 = vmatprep.subr.bf16.mxu0 %v458_v0 }
  0x35   :  { %394 = vmatpush3.bf16.msra.mxu0 %v393_v25 }
 0x103   :  { %v134_v19 = vpop.f32.mrb[0].mxu0 }
 0x104   :  { %v135_v20 = vadd.f32 %v322_v18, %v134_v19  ;;  %v354_v21 = vpop.f32.mrb[1].mxu0 }
 0x106   :  { %v138_v22 = vmax.f32 %v135_v20, 0.0 }
 0x108   :  { %364 = vmatmul.mubr.msk.f32.vlgmr.msra.gmra.mrb[0].mxu1 %vm64_vm1, %v138_v22 }
 0x1db   :  { %v219_v27 = vpop.f32.mrb[0].mxu1 }
 0x1dc   :  { %v220_v28 = vadd.f32 %v324_v26, %v219_v27  ;;  %v365_v29 = vpop.f32.mrb[1].mxu1 }
 0x1de   :  { %v223_v30 = vmax.f32 %v220_v28, 0.0 }
 0x1e0   :  { %375 = vmatmul.mubr.msk.f32.vlgmr.msra.gmra.mrb[2].mxu0 %vm64_vm1, %v223_v30 }
 0x2b3   :  { %v304_v32 = vpop.f32.mrb[2].mxu0 }
 0x2b4   :  { %v305_v33 = vadd.f32 %v326_v31, %v304_v32  ;;  %v376_v34 = vpop.f32.mrb[3].mxu0 }
 0x2b6   :  { %v328_v35 = vmul.f32 -1.442695, %v305_v33 }
 0x2b8   :  { %402 = vpow2.f32 %v328_v35 }
 0x2c2   :  { %v403_v36 = vpop.eup %402 }
 0x2c3   :  { %v311_v37 = vadd.f32 1.0, %v403_v36 }
 0x2c5   :  { %404 = vrcp.f32 %v311_v37 }
 0x2cf   :  { %v405_v38 = vpop.eup %404 }
 0x2d0   :  { %315 = vst.msk [vmem:[%s581_s7] sm:$0xff] %vm314_vm2, %v405_v38 }
 0x2d1   :  { %320 = vsyncpa [#allocation3], 1 }
 0x2d2   :  { %321 = vsyncpa [#allocation5], 1 }

</bundles_post_ra>
